<compile_context>
chip_gen: v7x
topology: tpu7x:2x2x1
jax: 0.10.0
libtpu: 0.0.40
codegen_flags: <defaults>
</compile_context>

<pallas_src>
import functools

import jax
import jax.numpy as jnp
from jax.experimental import pallas as pl
from jax.experimental.pallas import tpu as pltpu

LANE = 128  # TPU lane width; all packed weights / activations are padded to this.


# ----------------------------------------------------------------------------- kernel

def _textcnn2_kernel(ids_ref, w_ref, b_ref, o_ref, *, spb, seq_len, ksize, v_pad):
    """Fused: embed -> conv1 -> ReLU -> conv2 -> ReLU -> masked max-pool -> FC head.

    ids_ref : (spb*seq_len, 1) int32   token ids for this batch block
    w_ref   : (v_pad + (2k+2)*128, 128) bf16 packed weight slab
    b_ref   : (4, 128) f32             packed biases [c1, c2, cf1, bf2]
    o_ref   : (spb, 128) f32           lane-padded logits block
    """
    rows = spb * seq_len
    l2 = seq_len - 2 * (ksize - 1)          # valid conv2 length per sample

    # static row offsets inside the weight slab (all multiples of 128)
    w1_off = v_pad
    w2_off = w1_off + ksize * LANE
    wf1_off = w2_off + ksize * LANE
    wf2_off = wf1_off + LANE

    biases = b_ref[...]                      # (4, 128) f32
    c1 = biases[0:1, :]
    c2 = biases[1:2, :]
    cf1 = biases[2:3, :]
    bf2 = biases[3:4, :]

    # ---- embedding lookup as one-hot matmul against the resident padded table ----
    ids = ids_ref[...]                                                # (rows, 1) int32
    iota_v = jax.lax.broadcasted_iota(jnp.int32, (rows, v_pad), 1)
    onehot = (iota_v == ids).astype(jnp.bfloat16)                     # (rows, v_pad)
    x = jnp.dot(onehot, w_ref[0:v_pad, :],
                preferred_element_type=jnp.float32)                   # (rows, 128) f32

    # ---- conv = k matmul-accumulates; tap shift via XLU sublane roll (no im2col) ----
    # Rolled/wrapped ("contaminated") rows are never read by the masked pool below.
    def conv(act_f32, base_off):
        acc = jnp.zeros((rows, LANE), jnp.float32)
        for t in range(ksize):
            shifted = act_f32 if t == 0 else pltpu.roll(act_f32, rows - t, axis=0)
            w_t = w_ref[base_off + t * LANE: base_off + (t + 1) * LANE, :]
            acc = acc + jnp.dot(shifted.astype(jnp.bfloat16), w_t,
                                preferred_element_type=jnp.float32)
        return acc

    y1 = jnp.maximum(conv(x, w1_off) + c1, 0.0)     # conv1 (+folded BN) + ReLU
    y2 = jnp.maximum(conv(y1, w2_off) + c2, 0.0)    # conv2 (+folded BN) + ReLU

    # ---- per-sample global max-pool: mask invalid rows, one vectorized reduction ----
    y2_3d = y2.reshape(spb, seq_len, LANE)
    pos = jax.lax.broadcasted_iota(jnp.int32, (spb, seq_len, LANE), 1)
    pooled = jnp.max(jnp.where(pos < l2, y2_3d, -jnp.inf), axis=1)    # (spb, 128)

    # ---- FC head: Linear -> BN(folded) -> ReLU -> Linear (dropout = eval identity) ----
    h = jnp.dot(pooled.astype(jnp.bfloat16), w_ref[wf1_off:wf1_off + LANE, :],
                preferred_element_type=jnp.float32)
    h = jnp.maximum(h + cf1, 0.0)
    logits = jnp.dot(h.astype(jnp.bfloat16), w_ref[wf2_off:wf2_off + LANE, :],
                     preferred_element_type=jnp.float32) + bf2
    o_ref[...] = logits.astype(o_ref.dtype)


# ----------------------------------------------------------------------------- wrapper

def _pick_samples_per_block(batch, seq_len, target_rows=512):
    """Largest batch-block that keeps blocks sublane-aligned and ~target_rows rows."""
    cands = [d for d in range(1, batch + 1)
             if batch % d == 0 and (d == batch or d % 8 == 0)]
    fitting = [d for d in cands if d * seq_len <= target_rows]
    return max(fitting) if fitting else min(cands)


@functools.partial(jax.jit, static_argnames=("ksize", "num_classes"))
def textcnn2_forward(params, token_ids, *, ksize, num_classes):
    w_slab = params["w_slab"]                 # (v_pad + (2k+2)*128, 128) bf16
    b_slab = params["b_slab"]                 # (4, 128) f32
    batch, seq_len = token_ids.shape
    l2 = seq_len - 2 * (ksize - 1)
    assert l2 >= 1, "sequence too short for two VALID convolutions"
    v_pad = w_slab.shape[0] - (2 * ksize + 2) * LANE

    spb = _pick_samples_per_block(batch, seq_len)
    grid = (batch // spb,)

    ids = token_ids.reshape(batch * seq_len, 1).astype(jnp.int32)
    kernel = functools.partial(_textcnn2_kernel, spb=spb, seq_len=seq_len,
                               ksize=ksize, v_pad=v_pad)

    out = pl.pallas_call(
        kernel,
        grid=grid,
        in_specs=[
            pl.BlockSpec((spb * seq_len, 1), lambda i: (i, 0)),    # per-block token ids
            pl.BlockSpec(w_slab.shape, lambda i: (0, 0)),          # weights: resident
            pl.BlockSpec(b_slab.shape, lambda i: (0, 0)),          # biases: resident
        ],
        out_specs=pl.BlockSpec((spb, LANE), lambda i: (i, 0)),     # lane-dense logits
        out_shape=jax.ShapeDtypeStruct((batch, LANE), jnp.float32),
        compiler_params=pltpu.CompilerParams(
            dimension_semantics=("parallel",),
            vmem_limit_bytes=32 * 1024 * 1024),
    )(ids, w_slab, b_slab)
    return out[:, :num_classes]


# ----------------------------------------------------------------------------- params

def fold_bn(conv_bias, gamma, beta, mean, var, eps=1e-5):
    scale = gamma / jnp.sqrt(var + eps)
    bias = beta + scale * (conv_bias - mean)
    return scale, bias                        # both (C,)


def _pad2(a, rows, cols=LANE):
    out = jnp.zeros((rows, cols), jnp.float32)
    return out.at[:a.shape[0], :a.shape[1]].set(a)


def pack_params(embedding, branches, fc, ksize, filter_size):
    """Fold BN into weights and pack everything into two lane-aligned slabs.

    branches: list of (w1 (k,E,F), s1 (F,), c1 (F,), w2 (k,F,F), s2 (F,), c2 (F,))
    fc: (wf1 (F_tot,H), sfc (H,), cfc (H,), wf2 (H,C), bf2 (C,))
    Returns {"w_slab": bf16 (v_pad + (2k+2)*128, 128), "b_slab": f32 (4, 128)}.
    """
    n_br = len(branches)
    f_tot = filter_size * n_br
    v = embedding.shape[0]
    v_pad = ((v + LANE - 1) // LANE) * LANE

    blocks = [_pad2(embedding, v_pad)]
    # conv1 taps: branch filter banks concatenated along output channels, BN folded.
    for t in range(ksize):
        wt = jnp.concatenate([w1b[t] * s1b[None, :]
                              for (w1b, s1b, _, _, _, _) in branches], axis=1)
        blocks.append(_pad2(wt, LANE))
    # conv2 taps: block-diagonal over branches, BN folded.
    for t in range(ksize):
        wt = jnp.zeros((f_tot, f_tot), jnp.float32)
        for i, (_, _, _, w2b, s2b, _) in enumerate(branches):
            lo, hi = i * filter_size, (i + 1) * filter_size
            wt = wt.at[lo:hi, lo:hi].set(w2b[t] * s2b[None, :])
        blocks.append(_pad2(wt, LANE))
    wf1, sfc, cfc, wf2, bf2 = fc
    blocks.append(_pad2(wf1 * sfc[None, :], LANE))   # BN scale folded into fc1
    blocks.append(_pad2(wf2, LANE))
    w_slab = jnp.concatenate(blocks, axis=0).astype(jnp.bfloat16)

    def _padrow(x):
        return jnp.zeros((LANE,), jnp.float32).at[:x.shape[0]].set(x)

    c1 = jnp.concatenate([b[2] for b in branches])
    c2 = jnp.concatenate([b[5] for b in branches])
    b_slab = jnp.stack([_padrow(c1), _padrow(c2), _padrow(cfc), _padrow(bf2)], axis=0)
    return {"w_slab": w_slab, "b_slab": b_slab}


# ----------------------------------------------------------------------------- reference

def reference_forward(raw, token_ids):
    hi = jax.lax.Precision.HIGHEST
    emb = jnp.take(raw["embedding"], token_ids, axis=0)
    pooled = []
    for (w1, s1, c1, w2, s2, c2) in raw["branches"]:
        y1 = jax.lax.conv_general_dilated(emb, w1, (1,), "VALID",
                                          dimension_numbers=("NWC", "WIO", "NWC"),
                                          precision=hi)
        y1 = jnp.maximum(y1 * s1 + c1, 0.0)
        y2 = jax.lax.conv_general_dilated(y1, w2, (1,), "VALID",
                                          dimension_numbers=("NWC", "WIO", "NWC"),
                                          precision=hi)
        y2 = jnp.maximum(y2 * s2 + c2, 0.0)
        pooled.append(jnp.max(y2, axis=1))
    x = jnp.concatenate(pooled, axis=1)
    wf1, sf, cf, wf2, bf2 = raw["fc"]
    h = jnp.maximum(jnp.dot(x, wf1, precision=hi) * sf + cf, 0.0)
    return jnp.dot(h, wf2, precision=hi) + bf2


# ----------------------------------------------------------------------------- main

if __name__ == "__main__":
    key = jax.random.PRNGKey(0)
    B, L = 2, 16                 # batch, max_seq_len
    V, E = 50, 32                # vocab_size, embedding_dim
    F, H, C = 16, 32, 4          # filter_size, hidden_size, label_size
    kernel_size_list = [3, 3]    # tp.kernel_size == 3 (pool window == full conv2 length)
    ksize = kernel_size_list[0]
    assert all(k == ksize for k in kernel_size_list)
    eps = 1e-5

    keys = iter(jax.random.split(key, 40))
    embedding = jax.random.normal(next(keys), (V, E), jnp.float32) * 0.1

    branches = []
    for _ in kernel_size_list:
        w1 = jax.random.normal(next(keys), (ksize, E, F), jnp.float32) / (E * ksize) ** 0.5
        b1 = jax.random.normal(next(keys), (F,), jnp.float32) * 0.01
        g1 = 1.0 + 0.2 * jax.random.normal(next(keys), (F,), jnp.float32)
        be1 = 0.1 * jax.random.normal(next(keys), (F,), jnp.float32)
        m1 = 0.05 * jax.random.normal(next(keys), (F,), jnp.float32)
        v1 = 0.5 + jax.random.uniform(next(keys), (F,), jnp.float32)
        w2 = jax.random.normal(next(keys), (ksize, F, F), jnp.float32) / (F * ksize) ** 0.5
        b2 = jax.random.normal(next(keys), (F,), jnp.float32) * 0.01
        g2 = 1.0 + 0.2 * jax.random.normal(next(keys), (F,), jnp.float32)
        be2 = 0.1 * jax.random.normal(next(keys), (F,), jnp.float32)
        m2 = 0.05 * jax.random.normal(next(keys), (F,), jnp.float32)
        v2 = 0.5 + jax.random.uniform(next(keys), (F,), jnp.float32)
        s1, c1 = fold_bn(b1, g1, be1, m1, v1, eps)
        s2, c2 = fold_bn(b2, g2, be2, m2, v2, eps)
        branches.append((w1, s1, c1, w2, s2, c2))

    fin = F * len(kernel_size_list)
    wf1 = jax.random.normal(next(keys), (fin, H), jnp.float32) / fin ** 0.5
    bf1 = jax.random.normal(next(keys), (H,), jnp.float32) * 0.01
    gfc = 1.0 + 0.2 * jax.random.normal(next(keys), (H,), jnp.float32)
    befc = 0.1 * jax.random.normal(next(keys), (H,), jnp.float32)
    mfc = 0.05 * jax.random.normal(next(keys), (H,), jnp.float32)
    vfc = 0.5 + jax.random.uniform(next(keys), (H,), jnp.float32)
    sfc, cfc = fold_bn(bf1, gfc, befc, mfc, vfc, eps)
    wf2 = jax.random.normal(next(keys), (H, C), jnp.float32) / H ** 0.5
    bf2 = jax.random.normal(next(keys), (C,), jnp.float32) * 0.01

    raw = {"embedding": embedding, "branches": branches,
           "fc": (wf1, sfc, cfc, wf2, bf2)}
    params = pack_params(embedding, branches, (wf1, sfc, cfc, wf2, bf2), ksize, F)

    token_ids = jax.random.randint(next(keys), (B, L), 0, V, dtype=jnp.int32)

    logits = jax.block_until_ready(
        textcnn2_forward(params, token_ids, ksize=ksize, num_classes=C))
    ref = reference_forward(raw, token_ids)

    assert logits.shape == (B, C), logits.shape
    assert bool(jnp.all(jnp.isfinite(logits)))
    # bf16 MXU weights/activations vs. f32 HIGHEST-precision reference -> modest tolerance.
    assert jnp.allclose(logits, ref, rtol=3e-2, atol=2e-2), (logits, ref)
    print("KERNEL_OK")
</pallas_src>

<mosaic_0001>
module attributes {stable_mosaic.version = 11 : i64} {
  func.func @_textcnn2_kernel(%arg0: i32, %arg1: memref<32x1xi32, #tpu.memory_space<vmem>>, %arg2: memref<1152x128xbf16, #tpu.memory_space<vmem>>, %arg3: memref<4x128xf32, #tpu.memory_space<vmem>>, %arg4: memref<2x128xf32, #tpu.memory_space<vmem>>) attributes {dimension_semantics = [#tpu.dimension_semantics<parallel>], iteration_bounds = array<i64: 1>, scalar_prefetch = 0 : i64, scratch_operands = 0 : i64, tpu.core_type = #tpu.core_type<tc>, window_params = [{transform_indices = @transform_0, window_bounds = array<i64: 32, 1>}, {pipeline_mode = #tpu.pipeline_mode<synchronous>, transform_indices = @transform_1, window_bounds = array<i64: 1152, 128>}, {pipeline_mode = #tpu.pipeline_mode<synchronous>, transform_indices = @transform_2, window_bounds = array<i64: 4, 128>}, {transform_indices = @transform_3, window_bounds = array<i64: 2, 128>}]} {
    %c0 = arith.constant 0 : index
    %c0_0 = arith.constant 0 : index
    %0 = vector.load %arg3[%c0, %c0_0] : memref<4x128xf32, #tpu.memory_space<vmem>>, vector<4x128xf32>
    %1 = vector.extract_strided_slice %0 {offsets = [0, 0], sizes = [1, 128], strides = [1, 1]} : vector<4x128xf32> to vector<1x128xf32>
    %2 = vector.extract_strided_slice %0 {offsets = [1, 0], sizes = [1, 128], strides = [1, 1]} : vector<4x128xf32> to vector<1x128xf32>
    %3 = vector.extract_strided_slice %0 {offsets = [2, 0], sizes = [1, 128], strides = [1, 1]} : vector<4x128xf32> to vector<1x128xf32>
    %4 = vector.extract_strided_slice %0 {offsets = [3, 0], sizes = [1, 128], strides = [1, 1]} : vector<4x128xf32> to vector<1x128xf32>
    %c0_1 = arith.constant 0 : index
    %c0_2 = arith.constant 0 : index
    %5 = vector.load %arg1[%c0_1, %c0_2] : memref<32x1xi32, #tpu.memory_space<vmem>>, vector<32x1xi32>
    %6 = tpu.iota {dimensions = array<i32: 1>} : vector<32x128xi32>
    %7 = vector.broadcast %5 : vector<32x1xi32> to vector<32x128xi32>
    %8 = arith.cmpi eq, %6, %7 : vector<32x128xi32>
    %9 = arith.extui %8 : vector<32x128xi1> to vector<32x128xi32>
    %10 = arith.sitofp %9 : vector<32x128xi32> to vector<32x128xf32>
    %11 = arith.truncf %10 : vector<32x128xf32> to vector<32x128xbf16>
    %c0_3 = arith.constant 0 : index
    %c0_4 = arith.constant 0 : index
    %12 = vector.load %arg2[%c0_3, %c0_4] : memref<1152x128xbf16, #tpu.memory_space<vmem>>, vector<128x128xbf16>
    %cst = arith.constant dense<0.000000e+00> : vector<32x128xf32>
    %13 = tpu.matmul %11, %12, %cst {dimension_numbers = #tpu.dot_dimension_numbers<[1], [0], [0], [1], [0, 0, 1, 1], [], []>} : vector<32x128xbf16>, vector<128x128xbf16>, vector<32x128xf32> -> vector<32x128xf32>
    %cst_5 = arith.constant 0.000000e+00 : f32
    %14 = vector.broadcast %cst_5 : f32 to vector<32x128xf32>
    %c128 = arith.constant 128 : index
    %c0_6 = arith.constant 0 : index
    %15 = vector.load %arg2[%c128, %c0_6] : memref<1152x128xbf16, #tpu.memory_space<vmem>>, vector<128x128xbf16>
    %16 = arith.truncf %13 : vector<32x128xf32> to vector<32x128xbf16>
    %cst_7 = arith.constant dense<0.000000e+00> : vector<32x128xf32>
    %17 = tpu.matmul %16, %15, %cst_7 {dimension_numbers = #tpu.dot_dimension_numbers<[1], [0], [0], [1], [0, 0, 1, 1], [], []>} : vector<32x128xbf16>, vector<128x128xbf16>, vector<32x128xf32> -> vector<32x128xf32>
    %18 = arith.addf %14, %17 : vector<32x128xf32>
    %c31_i32 = arith.constant 31 : i32
    %19 = tpu.dynamic_rotate %13 by %c31_i32 dim 0 : vector<32x128xf32>, i32 -> vector<32x128xf32>
    %c256 = arith.constant 256 : index
    %c0_8 = arith.constant 0 : index
    %20 = vector.load %arg2[%c256, %c0_8] : memref<1152x128xbf16, #tpu.memory_space<vmem>>, vector<128x128xbf16>
    %21 = arith.truncf %19 : vector<32x128xf32> to vector<32x128xbf16>
    %cst_9 = arith.constant dense<0.000000e+00> : vector<32x128xf32>
    %22 = tpu.matmul %21, %20, %cst_9 {dimension_numbers = #tpu.dot_dimension_numbers<[1], [0], [0], [1], [0, 0, 1, 1], [], []>} : vector<32x128xbf16>, vector<128x128xbf16>, vector<32x128xf32> -> vector<32x128xf32>
    %23 = arith.addf %18, %22 : vector<32x128xf32>
    %c30_i32 = arith.constant 30 : i32
    %24 = tpu.dynamic_rotate %13 by %c30_i32 dim 0 : vector<32x128xf32>, i32 -> vector<32x128xf32>
    %c384 = arith.constant 384 : index
    %c0_10 = arith.constant 0 : index
    %25 = vector.load %arg2[%c384, %c0_10] : memref<1152x128xbf16, #tpu.memory_space<vmem>>, vector<128x128xbf16>
    %26 = arith.truncf %24 : vector<32x128xf32> to vector<32x128xbf16>
    %cst_11 = arith.constant dense<0.000000e+00> : vector<32x128xf32>
    %27 = tpu.matmul %26, %25, %cst_11 {dimension_numbers = #tpu.dot_dimension_numbers<[1], [0], [0], [1], [0, 0, 1, 1], [], []>} : vector<32x128xbf16>, vector<128x128xbf16>, vector<32x128xf32> -> vector<32x128xf32>
    %28 = arith.addf %23, %27 : vector<32x128xf32>
    %29 = vector.broadcast %1 : vector<1x128xf32> to vector<32x128xf32>
    %30 = arith.addf %28, %29 : vector<32x128xf32>
    %cst_12 = arith.constant 0.000000e+00 : f32
    %31 = vector.broadcast %cst_12 : f32 to vector<32x128xf32>
    %32 = arith.maximumf %30, %31 : vector<32x128xf32>
    %cst_13 = arith.constant 0.000000e+00 : f32
    %33 = vector.broadcast %cst_13 : f32 to vector<32x128xf32>
    %c512 = arith.constant 512 : index
    %c0_14 = arith.constant 0 : index
    %34 = vector.load %arg2[%c512, %c0_14] : memref<1152x128xbf16, #tpu.memory_space<vmem>>, vector<128x128xbf16>
    %35 = arith.truncf %32 : vector<32x128xf32> to vector<32x128xbf16>
    %cst_15 = arith.constant dense<0.000000e+00> : vector<32x128xf32>
    %36 = tpu.matmul %35, %34, %cst_15 {dimension_numbers = #tpu.dot_dimension_numbers<[1], [0], [0], [1], [0, 0, 1, 1], [], []>} : vector<32x128xbf16>, vector<128x128xbf16>, vector<32x128xf32> -> vector<32x128xf32>
    %37 = arith.addf %33, %36 : vector<32x128xf32>
    %c31_i32_16 = arith.constant 31 : i32
    %38 = tpu.dynamic_rotate %32 by %c31_i32_16 dim 0 : vector<32x128xf32>, i32 -> vector<32x128xf32>
    %c640 = arith.constant 640 : index
    %c0_17 = arith.constant 0 : index
    %39 = vector.load %arg2[%c640, %c0_17] : memref<1152x128xbf16, #tpu.memory_space<vmem>>, vector<128x128xbf16>
    %40 = arith.truncf %38 : vector<32x128xf32> to vector<32x128xbf16>
    %cst_18 = arith.constant dense<0.000000e+00> : vector<32x128xf32>
    %41 = tpu.matmul %40, %39, %cst_18 {dimension_numbers = #tpu.dot_dimension_numbers<[1], [0], [0], [1], [0, 0, 1, 1], [], []>} : vector<32x128xbf16>, vector<128x128xbf16>, vector<32x128xf32> -> vector<32x128xf32>
    %42 = arith.addf %37, %41 : vector<32x128xf32>
    %c30_i32_19 = arith.constant 30 : i32
    %43 = tpu.dynamic_rotate %32 by %c30_i32_19 dim 0 : vector<32x128xf32>, i32 -> vector<32x128xf32>
    %c768 = arith.constant 768 : index
    %c0_20 = arith.constant 0 : index
    %44 = vector.load %arg2[%c768, %c0_20] : memref<1152x128xbf16, #tpu.memory_space<vmem>>, vector<128x128xbf16>
    %45 = arith.truncf %43 : vector<32x128xf32> to vector<32x128xbf16>
    %cst_21 = arith.constant dense<0.000000e+00> : vector<32x128xf32>
    %46 = tpu.matmul %45, %44, %cst_21 {dimension_numbers = #tpu.dot_dimension_numbers<[1], [0], [0], [1], [0, 0, 1, 1], [], []>} : vector<32x128xbf16>, vector<128x128xbf16>, vector<32x128xf32> -> vector<32x128xf32>
    %47 = arith.addf %42, %46 : vector<32x128xf32>
    %48 = vector.broadcast %2 : vector<1x128xf32> to vector<32x128xf32>
    %49 = arith.addf %47, %48 : vector<32x128xf32>
    %cst_22 = arith.constant 0.000000e+00 : f32
    %50 = vector.broadcast %cst_22 : f32 to vector<32x128xf32>
    %51 = arith.maximumf %49, %50 : vector<32x128xf32>
    %52 = vector.shape_cast %51 : vector<32x128xf32> to vector<2x16x128xf32>
    %53 = tpu.iota {dimensions = array<i32: 1>} : vector<2x16x128xi32>
    %c12_i32 = arith.constant 12 : i32
    %54 = vector.broadcast %c12_i32 : i32 to vector<2x16x128xi32>
    %55 = arith.cmpi slt, %53, %54 : vector<2x16x128xi32>
    %cst_23 = arith.constant 0xFF800000 : f32
    %56 = vector.broadcast %cst_23 : f32 to vector<2x16x128xf32>
    %57 = arith.select %55, %52, %56 : vector<2x16x128xi1>, vector<2x16x128xf32>
    %cst_24 = arith.constant dense<0xFF800000> : vector<2x128xf32>
    %58 = vector.multi_reduction <maximumf>, %57, %cst_24 [1] : vector<2x16x128xf32> to vector<2x128xf32>
    %59 = arith.truncf %58 : vector<2x128xf32> to vector<2x128xbf16>
    %c896 = arith.constant 896 : index
    %c0_25 = arith.constant 0 : index
    %60 = vector.load %arg2[%c896, %c0_25] : memref<1152x128xbf16, #tpu.memory_space<vmem>>, vector<128x128xbf16>
    %cst_26 = arith.constant dense<0.000000e+00> : vector<2x128xf32>
    %61 = tpu.matmul %59, %60, %cst_26 {dimension_numbers = #tpu.dot_dimension_numbers<[1], [0], [0], [1], [0, 0, 1, 1], [], []>} : vector<2x128xbf16>, vector<128x128xbf16>, vector<2x128xf32> -> vector<2x128xf32>
    %62 = vector.broadcast %3 : vector<1x128xf32> to vector<2x128xf32>
    %63 = arith.addf %61, %62 : vector<2x128xf32>
    %cst_27 = arith.constant 0.000000e+00 : f32
    %64 = vector.broadcast %cst_27 : f32 to vector<2x128xf32>
    %65 = arith.maximumf %63, %64 : vector<2x128xf32>
    %66 = arith.truncf %65 : vector<2x128xf32> to vector<2x128xbf16>
    %c1024 = arith.constant 1024 : index
    %c0_28 = arith.constant 0 : index
    %67 = vector.load %arg2[%c1024, %c0_28] : memref<1152x128xbf16, #tpu.memory_space<vmem>>, vector<128x128xbf16>
    %cst_29 = arith.constant dense<0.000000e+00> : vector<2x128xf32>
    %68 = tpu.matmul %66, %67, %cst_29 {dimension_numbers = #tpu.dot_dimension_numbers<[1], [0], [0], [1], [0, 0, 1, 1], [], []>} : vector<2x128xbf16>, vector<128x128xbf16>, vector<2x128xf32> -> vector<2x128xf32>
    %69 = vector.broadcast %4 : vector<1x128xf32> to vector<2x128xf32>
    %70 = arith.addf %68, %69 : vector<2x128xf32>
    %c0_30 = arith.constant 0 : index
    %c0_31 = arith.constant 0 : index
    %71 = vector.load %arg4[%c0_30, %c0_31] : memref<2x128xf32, #tpu.memory_space<vmem>>, vector<2x128xf32>
    tpu.vector_store %arg4[%c0_30, %c0_31], %70 {strides = array<i32>} : memref<2x128xf32, #tpu.memory_space<vmem>>, vector<2x128xf32>,
    return
  }
  func.func @transform_0(%arg0: i32) -> (i32, i32) {
    %c0_i32 = arith.constant 0 : i32
    %c0_i32_0 = arith.constant 0 : i32
    return %arg0, %c0_i32 : i32, i32
  }
  func.func @transform_1(%arg0: i32) -> (i32, i32) {
    %c0_i32 = arith.constant 0 : i32
    %c0_i32_0 = arith.constant 0 : i32
    %c0_i32_1 = arith.constant 0 : i32
    return %c0_i32, %c0_i32_0 : i32, i32
  }
  func.func @transform_2(%arg0: i32) -> (i32, i32) {
    %c0_i32 = arith.constant 0 : i32
    %c0_i32_0 = arith.constant 0 : i32
    %c0_i32_1 = arith.constant 0 : i32
    return %c0_i32, %c0_i32_0 : i32, i32
  }
  func.func @transform_3(%arg0: i32) -> (i32, i32) {
    %c0_i32 = arith.constant 0 : i32
    %c0_i32_0 = arith.constant 0 : i32
    return %arg0, %c0_i32 : i32, i32
  }
}

</mosaic_0001>

<bundles_post_ra>
// kernel: textcnn2_forward.1
= control target key start
LH: loop header
LB: loop body
LE: loop exit
PB: predicated region body
PF: predicated region fallthrough
CT: control target
= control target key end

     0   :  { %8 = vsyncpa [#allocation3], 0  ;;  %s1828_s0 = inlined_call_operand.vmem [shape: s32[32,1], index: 0, kind: input, shape index: {}]   ;;  %s1829_s1 = inlined_call_operand.hbm [shape: bf16[1152,128], index: 1, kind: input, shape index: {}]   ;;  %s1830_s2 = inlined_call_operand.vmem [shape: f32[4,128], index: 2, kind: input, shape index: {}]   ;;  %s1831_s3 = inlined_call_operand.hbm [shape: f32[2,128], index: 3, kind: output, shape index: {}]  }
   0x1   :  { %9 = vsyncpa [#allocation4], 0  ;;  %s1693_s12 = smov [#allocation2]   ;;  %s1645_s16 = scalar_lea.hbm %s1829_s1, 9216 }
   0x2   :  { %s17_s13 = sshll.u32 %s1693_s12, 4  ;;  %p1646_p0 = scmp.ne.s32.totalorder %s1829_s1, %s1645_s16  ;;  %s18_s13 = int_to_ptr.vmem [resolvable:$true] %s17_s13 }
   0x3   :  { %p1649_p1 = scmp.lt.u32.totalorder %s1645_s16, %s1829_s1 }
   0x5   :  { %p1651_p2 = pnand %p1649_p1, %p1646_p0 }
   0x7   :  { %1654 = shalt.err (!%p1651_p2)
}
   0x8   :  { %s1655_s21 = scalar_lea.vmem %s18_s13, 9216  ;;  %p1660_p4 = scmp.lt.s32.totalorder %s18_s13, %s18_s13 }
   0x9   :  { %p1656_p3 = scmp.ne.s32.totalorder %s18_s13, %s1655_s21  ;;  %p1661_p5 = scmp.lt.s32.totalorder %s1655_s21, %s1655_s21 }
   0xb   :  { %p1662_p6 = por %p1661_p5, %p1660_p4 }
   0xd   :  { %p1663_p7 = pnand %p1662_p6, %p1656_p3 }
   0xf   :  { %1666 = shalt.err (!%p1663_p7)
}
  0x10   :  { %s1694_s22 = smov 64   ;;  %s1695_s23 = smov 4  }
  0x11   :  { %23 = dma.hbm_to_vmem [thread:$0]  %s1829_s1, 9216, %s18_s13, [#allocation3], %s1694_s22, %s1694_s22, %s1695_s23  }
  0x12   :  { %1689 = dma.done.wait [#allocation3], 9216  }
  0x13   :  { %1690 = vsyncadd [#allocation3], 4294958080  ;;  %v1696_v0 = vmov 0   ;;  %v33_v1 = vld [vmem:[%s1828_s0 + $0x10] sm:$0xff]  ;;  %v31_v2 = vld [vmem:[%s1828_s0] sm:$0xff]  ;;  %v35_v19 = vlaneseq  ;;  %vm1699_vm8 = vmmov 0  }
  0x14   :  { %1572 = vset.pattern.permute.xlu1 %v1696_v0  ;;  %1571 = vset.pattern.permute.xlu0 %v1696_v0  ;;  %v34_v3 = vld [vmem:[%s1828_s0 + $0x18] sm:$0xff]  ;;  %v32_v4 = vld [vmem:[%s1828_s0 + $0x8] sm:$0xff]  ;;  %v1573_v5 = vld [vmem:[#allocation2] sm:$0xff]   ;;  %v1697_v25 = vmov 1.0|1.0   ;;  %vm981_vm10 = vcmask 1041409  }
  0x15   :  { %44 = vperm.xlu1 %1572, %v33_v1   ;;  %38 = vperm.xlu0 %1571, %v31_v2   ;;  %v1574_v6 = vld [vmem:[#allocation2 + $0x8] sm:$0xff]   ;;  %v1575_v7 = vld [vmem:[#allocation2 + $0x10] sm:$0xff]   ;;  %v1576_v8 = vld [vmem:[#allocation2 + $0x18] sm:$0xff]   ;;  %v36_v22 = vand.u32 127, %v35_v19  ;;  %v1745_v34 = vshrl.u32 %v35_v19, 7 }
  0x16   :  { %1367 = vmatprep.subr.bf16.mxu0 %v1573_v5  ;;  %v1581_v9 = vld [vmem:[#allocation2 + $0x80] sm:$0xff]   ;;  %v1582_v10 = vld [vmem:[#allocation2 + $0x88] sm:$0xff]   ;;  %v1583_v11 = vld [vmem:[#allocation2 + $0x90] sm:$0xff]  }
  0x17   :  { %1368 = vmatpush3.bf16.msra.mxu0 %v1573_v5  ;;  %1387 = vmatprep.subr.bf16.mxu1 %v1581_v9  ;;  %v1577_v12 = vld [vmem:[#allocation2 + $0x20] sm:$0xff]   ;;  %v1584_v13 = vld [vmem:[#allocation2 + $0x98] sm:$0xff]   ;;  %v1578_v14 = vld [vmem:[#allocation2 + $0x28] sm:$0xff]   ;;  %vm421_vm6 = vcmp.lt.s32.totalorder %v1745_v34, 6  ;;  %vm200_vm7 = vcmp.lt.s32.totalorder %v1745_v34, 7 }
  0x18   :  { %1369 = vmatprep.subr.bf16.mxu0 %v1574_v6  ;;  %1388 = vmatpush3.bf16.msra.mxu1 %v1581_v9  ;;  %v1585_v15 = vld [vmem:[#allocation2 + $0xa0] sm:$0xff]   ;;  %v1579_v16 = vld [vmem:[#allocation2 + $0x30] sm:$0xff]   ;;  %v1586_v17 = vld [vmem:[#allocation2 + $0xa8] sm:$0xff]  }
  0x19   :  { %47 = vperm.xlu1 %1572, %v34_v3   ;;  %41 = vperm.xlu0 %1571, %v32_v4   ;;  %v1580_v18 = vld [vmem:[#allocation2 + $0x38] sm:$0xff]   ;;  %v1587_v26 = vld [vmem:[#allocation2 + $0xb0] sm:$0xff]   ;;  %v1589_v28 = vld [vmem:[#allocation2 + $0x40] sm:$0xff]  }
  0x1a   :  { %1389 = vmatprep.subr.bf16.mxu1 %v1582_v10  ;;  %v1588_v27 = vld [vmem:[#allocation2 + $0xb8] sm:$0xff]   ;;  %v1605_v29 = vld [vmem:[#allocation2 + $0x140] sm:$0xff]   ;;  %v1606_v30 = vld [vmem:[#allocation2 + $0x148] sm:$0xff]  }
  0x1b   :  { %1370 = vmatpush3.bf16.msra.mxu0 %v1574_v6  ;;  %v1607_v31 = vld [vmem:[#allocation2 + $0x150] sm:$0xff]   ;;  %v1608_v32 = vld [vmem:[#allocation2 + $0x158] sm:$0xff]   ;;  %v1609_v33 = vld [vmem:[#allocation2 + $0x160] sm:$0xff]  }
  0x1c   :  { %1371 = vmatprep.subr.bf16.mxu0 %v1575_v7  ;;  %1390 = vmatpush3.bf16.msra.mxu1 %v1582_v10  ;;  %v1590_v60 = vld [vmem:[#allocation2 + $0x48] sm:$0xff]   ;;  %v1591_v62 = vld [vmem:[#allocation2 + $0x50] sm:$0xff]   ;;  %v1592_v63 = vld [vmem:[#allocation2 + $0x58] sm:$0xff]  }
  0x1d   :  { %1391 = vmatprep.subr.bf16.mxu1 %v1583_v11  ;;  %v1593_v0 = vld [vmem:[#allocation2 + $0x60] sm:$0xff]   ;;  %v1594_v1 = vld [vmem:[#allocation2 + $0x68] sm:$0xff]   ;;  %v1595_v2 = vld [vmem:[#allocation2 + $0x70] sm:$0xff]  }
  0x1e   :  { %v1596_v3 = vld [vmem:[#allocation2 + $0x78] sm:$0xff]   ;;  %v1597_v4 = vld [vmem:[#allocation2 + $0xc0] sm:$0xff]   ;;  %v1598_v5 = vld [vmem:[#allocation2 + $0xc8] sm:$0xff]  }
  0x1f   :  { %1372 = vmatpush3.bf16.msra.mxu0 %v1575_v7  ;;  %v1599_v6 = vld [vmem:[#allocation2 + $0xd0] sm:$0xff]   ;;  %v1600_v7 = vld [vmem:[#allocation2 + $0xd8] sm:$0xff]   ;;  %v1602_v9 = vld [vmem:[#allocation2 + $0xe8] sm:$0xff]  }
  0x20   :  { %1373 = vmatprep.subr.bf16.mxu0 %v1576_v8  ;;  %1392 = vmatpush3.bf16.msra.mxu1 %v1583_v11  ;;  %v1603_v10 = vld [vmem:[#allocation2 + $0xf0] sm:$0xff]   ;;  %v1604_v11 = vld [vmem:[#allocation2 + $0xf8] sm:$0xff]   ;;  %v1774_v19 = vld [vmem:[%s1830_s2] sm:$0xf]  ;;  %s1700_s2 = smov [#allocation5]  }
  0x21   :  { %1393 = vmatprep.subr.bf16.mxu1 %v1584_v13  ;;  %s1190_s7 = sshll.u32 %s1700_s2, 4  ;;  %s1191_s7 = int_to_ptr.vmem [resolvable:$true] %s1190_s7 }
  0x22   :  { %s1667_s8 = scalar_lea.vmem %s1191_s7, 32  ;;  %p1672_p9 = scmp.lt.s32.totalorder %s1191_s7, %s1191_s7 }
  0x23   :  { %1374 = vmatpush3.bf16.msra.mxu0 %v1576_v8  ;;  %v1601_v8 = vld [vmem:[#allocation2 + $0xe0] sm:$0xff]   ;;  %p1668_p8 = scmp.ne.s32.totalorder %s1191_s7, %s1667_s8  ;;  %p1673_p10 = scmp.lt.s32.totalorder %s1667_s8, %s1667_s8 }
  0x24   :  { %1375 = vmatprep.subr.bf16.mxu0 %v1577_v12  ;;  %1394 = vmatpush3.bf16.msra.mxu1 %v1584_v13  ;;  %v1611_v13 = vld [vmem:[#allocation2 + $0x170] sm:$0xff]  }
  0x25   :  { %1395 = vmatprep.subr.bf16.mxu1 %v1585_v15  ;;  %p1674_p11 = por %p1673_p10, %p1672_p9 }
  0x27   :  { %1376 = vmatpush3.bf16.msra.mxu0 %v1577_v12  ;;  %v1610_v12 = vld [vmem:[#allocation2 + $0x168] sm:$0xff]   ;;  %p1675_p12 = pnand %p1674_p11, %p1668_p8 }
  0x28   :  { %1377 = vmatprep.subr.bf16.mxu0 %v1578_v14  ;;  %1396 = vmatpush3.bf16.msra.mxu1 %v1585_v15  ;;  %v1613_v15 = vld [vmem:[#allocation2 + $0x100] sm:$0xff]  }
  0x29   :  { %1397 = vmatprep.subr.bf16.mxu1 %v1586_v17 }
  0x2b   :  { %1378 = vmatpush3.bf16.msra.mxu0 %v1578_v14  ;;  %v1612_v14 = vld [vmem:[#allocation2 + $0x178] sm:$0xff]  }
  0x2c   :  { %1379 = vmatprep.subr.bf16.mxu0 %v1579_v16  ;;  %1398 = vmatpush3.bf16.msra.mxu1 %v1586_v17  ;;  %v1698_v17 = vmov 0.0  }
  0x2d   :  { %1399 = vmatprep.subr.bf16.mxu1 %v1587_v26 }
  0x2f   :  { %1380 = vmatpush3.bf16.msra.mxu0 %v1579_v16  ;;  %v1629_v16 = vld [vmem:[#allocation2 + $0x1c0] sm:$0xff]  }
  0x30   :  { %1381 = vmatprep.subr.bf16.mxu0 %v1580_v18  ;;  %1400 = vmatpush3.bf16.msra.mxu1 %v1587_v26 }
  0x31   :  { %1401 = vmatprep.subr.bf16.mxu1 %v1588_v27 }
  0x33   :  { %1382 = vmatpush3.bf16.msra.mxu0 %v1580_v18  ;;  %v547_v18 = vsub.s32 0, %v1745_v34 }
  0x34   :  { %1402 = vmatpush3.bf16.msra.mxu1 %v1588_v27  ;;  %1447 = vmatprep.subr.bf16.mxu0 %v1605_v29 }
  0x35   :  { %1407 = vmatprep.subr.bf16.mxu1 %v1589_v28 }
  0x94   :  { %v45_v20 = vpop.permute.xlu1 %44  ;;  %v39_v21 = vpop.permute.xlu0 %38 }
  0x95   :  { %vm51_vm0 = vcmp.eq.s32.totalorder %v36_v22, %v45_v20  ;;  %vm49_vm3 = vcmp.eq.s32.totalorder %v36_v22, %v39_v21  ;;  %v548_v20 = vrot.slane %v1774_v19, %v547_v18  ;;  %v1640_v18 = vld [vmem:[#allocation2 + $0x218] sm:$0xff]  }
  0x98   :  { %v48_v23 = vpop.permute.xlu1 %47  ;;  %v42_v24 = vpop.permute.xlu0 %41 }
  0x99   :  { %vm52_vm1 = vcmp.eq.s32.totalorder %v36_v22, %v48_v23  ;;  %vm50_vm2 = vcmp.eq.s32.totalorder %v36_v22, %v42_v24 }
  0x9a   :  { %vm1213_vm4 = vmpackc.low %vm52_vm1, %vm51_vm0 }
  0x9b   :  { %vm1211_vm5 = vmpackc.low %vm50_vm2, %vm49_vm3 }
  0x9c   :  { %1383 = vmatprep.mubr.msk.bf16.mxu0 %vm1211_vm5, %v1697_v25 }
  0x9d   :  { %1384 = vmatmul.mubr.msk.bf16.vlgmr.msra.gmra.mrb[0].mxu0 %vm1213_vm4, %v1697_v25 }
  0x9e   :  { %1448 = vmatpush3.bf16.msra.mxu0 %v1605_v29 }
  0x9f   :  { %1449 = vmatprep.subr.bf16.mxu0 %v1606_v30 }
  0xa2   :  { %1450 = vmatpush3.bf16.msra.mxu0 %v1606_v30 }
  0xa3   :  { %1451 = vmatprep.subr.bf16.mxu0 %v1607_v31 }
  0xa6   :  { %1452 = vmatpush3.bf16.msra.mxu0 %v1607_v31 }
  0xa7   :  { %1453 = vmatprep.subr.bf16.mxu0 %v1608_v32 }
  0xaa   :  { %1454 = vmatpush3.bf16.msra.mxu0 %v1608_v32 }
  0xab   :  { %1455 = vmatprep.subr.bf16.mxu0 %v1609_v33 }
  0xae   :  { %1456 = vmatpush3.bf16.msra.mxu0 %v1609_v33 }
  0xaf   :  { %1457 = vmatprep.subr.bf16.mxu0 %v1610_v12 }
  0xb2   :  { %1458 = vmatpush3.bf16.msra.mxu0 %v1610_v12  ;;  %v1635_v12 = vld [vmem:[#allocation2 + $0x1f0] sm:$0xff]  }
  0xb3   :  { %1459 = vmatprep.subr.bf16.mxu0 %v1611_v13 }
  0xb6   :  { %1460 = vmatpush3.bf16.msra.mxu0 %v1611_v13  ;;  %v1636_v13 = vld [vmem:[#allocation2 + $0x1f8] sm:$0xff]  }
  0xb7   :  { %1461 = vmatprep.subr.bf16.mxu0 %v1612_v14 }
  0xba   :  { %1462 = vmatpush3.bf16.msra.mxu0 %v1612_v14  ;;  %v1637_v14 = vld [vmem:[#allocation2 + $0x200] sm:$0xff]  }
  0xbb   :  { %1467 = vmatprep.subr.bf16.mxu0 %v1613_v15 }
 0x170   :  { %v1385_v35 = vpop.f32.mrb[0].mxu0 }
 0x171   :  { %v161_v36 = vpop.f32.mrb[1].mxu0  ;;  %v196_v37 = vrot.slane %v1385_v35, 1  ;;  %v419_v41 = vrot.slane %v1385_v35, 2 }
 0x172   :  { %v194_v38 = vrot.slane %v161_v36, 1  ;;  %v417_v39 = vrot.slane %v161_v36, 2  ;;  %v1386_v40 = vpop.f32.mrb[2].mxu0 }
 0x173   :  { %v193_v42 = vpack.c.bf16 %v1386_v40, %v1385_v35  ;;  %v197_v43 = vrot.slane %v1386_v40, 1  ;;  %v420_v44 = vrot.slane %v1386_v40, 2  ;;  %v164_v45 = vpop.f32.mrb[3].mxu0 }
 0x174   :  { %v192_v46 = vpack.c.bf16 %v164_v45, %v161_v36  ;;  %v195_v47 = vrot.slane %v164_v45, 1  ;;  %v418_v48 = vrot.slane %v164_v45, 2 }
 0x175   :  { %v1751_v49 = vsel %vm421_vm6, %v419_v41, %v420_v44  ;;  %v425_v50 = vsel %vm421_vm6, %v420_v44, %v417_v39  ;;  %v201_v51 = vsel %vm200_vm7, %v196_v37, %v197_v43  ;;  %v204_v52 = vsel %vm200_vm7, %v197_v43, %v194_v38 }
 0x176   :  { %v202_v53 = vsel %vm200_vm7, %v195_v47, %v196_v37  ;;  %v203_v54 = vsel %vm200_vm7, %v194_v38, %v195_v47  ;;  %v222_v55 = vpack.c.bf16 %v204_v52, %v201_v51  ;;  %v423_v56 = vsel %vm421_vm6, %v418_v48, %v419_v41 }
 0x177   :  { %v221_v57 = vpack.c.bf16 %v202_v53, %v203_v54  ;;  %v424_v58 = vsel %vm421_vm6, %v417_v39, %v418_v48  ;;  %v443_v59 = vpack.c.bf16 %v425_v50, %v1751_v49 }
 0x178   :  { %v442_v61 = vpack.c.bf16 %v423_v56, %v424_v58  ;;  %v1616_v58 = vld [vmem:[#allocation2 + $0x118] sm:$0xff]  }
 0x179   :  { %1403 = vmatprep.mubr.bf16.mxu1 %v221_v57  ;;  %v1615_v57 = vld [vmem:[#allocation2 + $0x110] sm:$0xff]  }
 0x17a   :  { %1404 = vmatmul.mubr.bf16.vlgmr.msra.gmra.mrb[0].mxu1 %v222_v55  ;;  %v1614_v55 = vld [vmem:[#allocation2 + $0x108] sm:$0xff]  }
 0x17b   :  { %1408 = vmatpush3.bf16.msra.mxu1 %v1589_v28  ;;  %1423 = vmatprep.mubr.bf16.mxu1 %v192_v46 }
 0x17c   :  { %1409 = vmatprep.subr.bf16.mxu1 %v1590_v60 }
 0x17f   :  { %1410 = vmatpush3.bf16.msra.mxu1 %v1590_v60  ;;  %v1618_v60 = vld [vmem:[#allocation2 + $0x128] sm:$0xff]  }
 0x180   :  { %1411 = vmatprep.subr.bf16.mxu1 %v1591_v62 }
 0x183   :  { %1412 = vmatpush3.bf16.msra.mxu1 %v1591_v62  ;;  %v1620_v62 = vld [vmem:[#allocation2 + $0x138] sm:$0xff]  }
 0x184   :  { %1413 = vmatprep.subr.bf16.mxu1 %v1592_v63 }
 0x187   :  { %1414 = vmatpush3.bf16.msra.mxu1 %v1592_v63  ;;  %v1621_v63 = vld [vmem:[#allocation2 + $0x180] sm:$0xff]  }
 0x188   :  { %1415 = vmatprep.subr.bf16.mxu1 %v1593_v0 }
 0x18b   :  { %1416 = vmatpush3.bf16.msra.mxu1 %v1593_v0  ;;  %v1622_v0 = vld [vmem:[#allocation2 + $0x188] sm:$0xff]  }
 0x18c   :  { %1417 = vmatprep.subr.bf16.mxu1 %v1594_v1 }
 0x18f   :  { %1418 = vmatpush3.bf16.msra.mxu1 %v1594_v1  ;;  %v1623_v1 = vld [vmem:[#allocation2 + $0x190] sm:$0xff]  }
 0x190   :  { %1419 = vmatprep.subr.bf16.mxu1 %v1595_v2 }
 0x193   :  { %1420 = vmatpush3.bf16.msra.mxu1 %v1595_v2  ;;  %v1624_v2 = vld [vmem:[#allocation2 + $0x198] sm:$0xff]  }
 0x194   :  { %1421 = vmatprep.subr.bf16.mxu1 %v1596_v3 }
 0x197   :  { %1422 = vmatpush3.bf16.msra.mxu1 %v1596_v3  ;;  %v1625_v3 = vld [vmem:[#allocation2 + $0x1a0] sm:$0xff]  }
 0x198   :  { %1427 = vmatprep.subr.bf16.mxu1 %v1597_v4 }
 0x19a   :  { %1424 = vmatmul.mubr.bf16.vlgmr.msra.gmra.mrb[0].mxu1 %v193_v42 }
 0x19b   :  { %1428 = vmatpush3.bf16.msra.mxu1 %v1597_v4  ;;  %1443 = vmatprep.mubr.bf16.mxu1 %v442_v61  ;;  %v1619_v61 = vld [vmem:[#allocation2 + $0x130] sm:$0xff]   ;;  %v1626_v4 = vld [vmem:[#allocation2 + $0x1a8] sm:$0xff]  }
 0x19c   :  { %1429 = vmatprep.subr.bf16.mxu1 %v1598_v5 }
 0x19f   :  { %1430 = vmatpush3.bf16.msra.mxu1 %v1598_v5  ;;  %v1627_v5 = vld [vmem:[#allocation2 + $0x1b0] sm:$0xff]  }
 0x1a0   :  { %1431 = vmatprep.subr.bf16.mxu1 %v1599_v6 }
 0x1a3   :  { %1432 = vmatpush3.bf16.msra.mxu1 %v1599_v6  ;;  %v1628_v6 = vld [vmem:[#allocation2 + $0x1b8] sm:$0xff]  }
 0x1a4   :  { %1433 = vmatprep.subr.bf16.mxu1 %v1600_v7 }
 0x1a7   :  { %1434 = vmatpush3.bf16.msra.mxu1 %v1600_v7  ;;  %v1630_v7 = vld [vmem:[#allocation2 + $0x1c8] sm:$0xff]  }
 0x1a8   :  { %1435 = vmatprep.subr.bf16.mxu1 %v1601_v8 }
 0x1ab   :  { %1436 = vmatpush3.bf16.msra.mxu1 %v1601_v8  ;;  %v1631_v8 = vld [vmem:[#allocation2 + $0x1d0] sm:$0xff]  }
 0x1ac   :  { %1437 = vmatprep.subr.bf16.mxu1 %v1602_v9 }
 0x1af   :  { %1438 = vmatpush3.bf16.msra.mxu1 %v1602_v9  ;;  %v1632_v9 = vld [vmem:[#allocation2 + $0x1d8] sm:$0xff]  }
 0x1b0   :  { %1439 = vmatprep.subr.bf16.mxu1 %v1603_v10 }
 0x1b3   :  { %1440 = vmatpush3.bf16.msra.mxu1 %v1603_v10  ;;  %v1633_v10 = vld [vmem:[#allocation2 + $0x1e0] sm:$0xff]  }
 0x1b4   :  { %1441 = vmatprep.subr.bf16.mxu1 %v1604_v11 }
 0x1b7   :  { %1442 = vmatpush3.bf16.msra.mxu1 %v1604_v11  ;;  %v1634_v11 = vld [vmem:[#allocation2 + $0x1e8] sm:$0xff]  }
 0x1b8   :  { %1507 = vmatprep.subr.bf16.mxu1 %v1698_v17 }
 0x1ba   :  { %1444 = vmatmul.mubr.bf16.vlgmr.msra.gmra.mrb[0].mxu1 %v443_v59  ;;  %v1617_v59 = vld [vmem:[#allocation2 + $0x120] sm:$0xff]  }
 0x1bb   :  { %1508 = vmatpush3.bf16.msra.mxu1 %v1629_v16  ;;  %1523 = vmatprep.mubr.msk.bf16.mxu1 %vm1699_vm8, %v1698_v17  ;;  %v1639_v16 = vld [vmem:[#allocation2 + $0x210] sm:$0xff]  }
 0x1bc   :  { %1509 = vmatprep.subr.bf16.mxu1 %v1698_v17 }
 0x1bf   :  { %1510 = vmatpush3.bf16.msra.mxu1 %v1630_v7  ;;  %v1093_v7 = vsub.s32 3, %v1745_v34 }
 0x1c0   :  { %1511 = vmatprep.subr.bf16.mxu1 %v1698_v17 }
 0x1c3   :  { %1512 = vmatpush3.bf16.msra.mxu1 %v1631_v8  ;;  %v1094_v8 = vrot.slane %v1774_v19, %v1093_v7 }
 0x1c4   :  { %1513 = vmatprep.subr.bf16.mxu1 %v1698_v17 }
 0x1c7   :  { %1514 = vmatpush3.bf16.msra.mxu1 %v1632_v9 }
 0x1c8   :  { %1515 = vmatprep.subr.bf16.mxu1 %v1698_v17 }
 0x1cb   :  { %1516 = vmatpush3.bf16.msra.mxu1 %v1633_v10 }
 0x1cc   :  { %1517 = vmatprep.subr.bf16.mxu1 %v1698_v17 }
 0x1cf   :  { %1518 = vmatpush3.bf16.msra.mxu1 %v1634_v11 }
 0x1d0   :  { %1519 = vmatprep.subr.bf16.mxu1 %v1698_v17 }
 0x1d3   :  { %1520 = vmatpush3.bf16.msra.mxu1 %v1635_v12 }
 0x1d4   :  { %1521 = vmatprep.subr.bf16.mxu1 %v1698_v17 }
 0x1d7   :  { %1522 = vmatpush3.bf16.msra.mxu1 %v1636_v13 }
 0x28d   :  { %v1445_v21 = vpop.f32.mrb[0].mxu1 }
 0x28e   :  { %v551_v22 = vadd.f32 %v1445_v21, %v548_v20  ;;  %v526_v23 = vpop.f32.mrb[1].mxu1  ;;  %v1642_v21 = vld [vmem:[#allocation2 + $0x228] sm:$0xff]  }
 0x28f   :  { %v549_v24 = vadd.f32 %v548_v20, %v526_v23  ;;  %v1446_v25 = vpop.f32.mrb[2].mxu1 }
 0x290   :  { %v555_v26 = vmax.f32 %v551_v22, 0.0  ;;  %v552_v27 = vadd.f32 %v1446_v25, %v548_v20  ;;  %v529_v28 = vpop.f32.mrb[3].mxu1  ;;  %v924_v22 = vsub.s32 1, %v1745_v34  ;;  %v934_v25 = vadd.s32 8, %v1745_v34 }
 0x291   :  { %v553_v29 = vmax.f32 %v549_v24, 0.0  ;;  %v550_v30 = vadd.f32 %v548_v20, %v529_v28  ;;  %v1641_v20 = vld [vmem:[#allocation2 + $0x220] sm:$0xff]  }
 0x292   :  { %v556_v31 = vmax.f32 %v552_v27, 0.0  ;;  %v577_v32 = vrot.slane %v555_v26, 1  ;;  %v797_v37 = vrot.slane %v555_v26, 2  ;;  %v925_v23 = vrot.slane %v1774_v19, %v924_v22 }
 0x293   :  { %v575_v33 = vrot.slane %v553_v29, 1  ;;  %v795_v35 = vrot.slane %v553_v29, 2  ;;  %v554_v36 = vmax.f32 %v550_v30, 0.0  ;;  %vm936_vm9 = vcmp.lt.s32.totalorder %v934_v25, 12 }
 0x294   :  { %v574_v38 = vpack.c.bf16 %v556_v31, %v555_v26  ;;  %v578_v39 = vrot.slane %v556_v31, 1  ;;  %v798_v40 = vrot.slane %v556_v31, 2 }
 0x295   :  { %v576_v41 = vrot.slane %v554_v36, 1  ;;  %v796_v42 = vrot.slane %v554_v36, 2  ;;  %v573_v43 = vpack.c.bf16 %v554_v36, %v553_v29 }
 0x296   :  { %v579_v44 = vsel %vm200_vm7, %v577_v32, %v578_v39  ;;  %v582_v45 = vsel %vm200_vm7, %v578_v39, %v575_v33  ;;  %v799_v46 = vsel %vm421_vm6, %v797_v37, %v798_v40  ;;  %v802_v47 = vsel %vm421_vm6, %v798_v40, %v795_v35 }
 0x297   :  { %v580_v48 = vsel %vm200_vm7, %v576_v41, %v577_v32  ;;  %v581_v49 = vsel %vm200_vm7, %v575_v33, %v576_v41  ;;  %v600_v50 = vpack.c.bf16 %v582_v45, %v579_v44  ;;  %v800_v51 = vsel %vm421_vm6, %v796_v42, %v797_v37 }
 0x298   :  { %v599_v52 = vpack.c.bf16 %v580_v48, %v581_v49  ;;  %v801_v53 = vsel %vm421_vm6, %v795_v35, %v796_v42  ;;  %v820_v54 = vpack.c.bf16 %v802_v47, %v799_v46 }
 0x299   :  { %v819_v56 = vpack.c.bf16 %v800_v51, %v801_v53 }
 0x29a   :  { %1463 = vmatprep.mubr.bf16.mxu0 %v599_v52 }
 0x29b   :  { %1464 = vmatmul.mubr.bf16.vlgmr.msra.gmra.mrb[4].mxu0 %v600_v50 }
 0x29c   :  { %1468 = vmatpush3.bf16.msra.mxu0 %v1613_v15  ;;  %1483 = vmatprep.mubr.bf16.mxu0 %v573_v43  ;;  %v1638_v15 = vld [vmem:[#allocation2 + $0x208] sm:$0xff]  }
 0x29d   :  { %1469 = vmatprep.subr.bf16.mxu0 %v1614_v55 }
 0x2a0   :  { %1470 = vmatpush3.bf16.msra.mxu0 %v1614_v55 }
 0x2a1   :  { %1471 = vmatprep.subr.bf16.mxu0 %v1615_v57 }
 0x2a4   :  { %1472 = vmatpush3.bf16.msra.mxu0 %v1615_v57 }
 0x2a5   :  { %1473 = vmatprep.subr.bf16.mxu0 %v1616_v58 }
 0x2a8   :  { %1474 = vmatpush3.bf16.msra.mxu0 %v1616_v58 }
 0x2a9   :  { %1475 = vmatprep.subr.bf16.mxu0 %v1617_v59 }
 0x2ac   :  { %1476 = vmatpush3.bf16.msra.mxu0 %v1617_v59 }
 0x2ad   :  { %1477 = vmatprep.subr.bf16.mxu0 %v1618_v60 }
 0x2b0   :  { %1478 = vmatpush3.bf16.msra.mxu0 %v1618_v60  ;;  %v1643_v60 = vld [vmem:[#allocation2 + $0x230] sm:$0xff]  }
 0x2b1   :  { %1479 = vmatprep.subr.bf16.mxu0 %v1619_v61 }
 0x2b4   :  { %1480 = vmatpush3.bf16.msra.mxu0 %v1619_v61  ;;  %v1644_v61 = vld [vmem:[#allocation2 + $0x238] sm:$0xff]  }
 0x2b5   :  { %1481 = vmatprep.subr.bf16.mxu0 %v1620_v62 }
 0x2b8   :  { %1482 = vmatpush3.bf16.msra.mxu0 %v1620_v62  ;;  %v975_v62 = vsub.s32 2, %v1745_v34 }
 0x2b9   :  { %1487 = vmatprep.subr.bf16.mxu0 %v1621_v63 }
 0x2bb   :  { %1484 = vmatmul.mubr.bf16.vlgmr.msra.gmra.mrb[4].mxu0 %v574_v38 }
 0x2bc   :  { %1488 = vmatpush3.bf16.msra.mxu0 %v1621_v63  ;;  %1503 = vmatprep.mubr.bf16.mxu0 %v819_v56  ;;  %v976_v63 = vrot.slane %v1774_v19, %v975_v62 }
 0x2bd   :  { %1489 = vmatprep.subr.bf16.mxu0 %v1622_v0 }
 0x2c0   :  { %1490 = vmatpush3.bf16.msra.mxu0 %v1622_v0 }
 0x2c1   :  { %1491 = vmatprep.subr.bf16.mxu0 %v1623_v1 }
 0x2c4   :  { %1492 = vmatpush3.bf16.msra.mxu0 %v1623_v1 }
 0x2c5   :  { %1493 = vmatprep.subr.bf16.mxu0 %v1624_v2 }
 0x2c8   :  { %1494 = vmatpush3.bf16.msra.mxu0 %v1624_v2 }
 0x2c9   :  { %1495 = vmatprep.subr.bf16.mxu0 %v1625_v3 }
 0x2cc   :  { %1496 = vmatpush3.bf16.msra.mxu0 %v1625_v3 }
 0x2cd   :  { %1497 = vmatprep.subr.bf16.mxu0 %v1626_v4 }
 0x2d0   :  { %1498 = vmatpush3.bf16.msra.mxu0 %v1626_v4 }
 0x2d1   :  { %1499 = vmatprep.subr.bf16.mxu0 %v1627_v5 }
 0x2d4   :  { %1500 = vmatpush3.bf16.msra.mxu0 %v1627_v5 }
 0x2d5   :  { %1501 = vmatprep.subr.bf16.mxu0 %v1628_v6 }
 0x2d8   :  { %1502 = vmatpush3.bf16.msra.mxu0 %v1628_v6 }
 0x2d9   :  { %1527 = vmatprep.subr.bf16.mxu0 %v1698_v17 }
 0x2db   :  { %1504 = vmatmul.mubr.bf16.vlgmr.msra.gmra.mrb[4].mxu0 %v820_v54 }
 0x2dc   :  { %1543 = vmatprep.mubr.msk.bf16.mxu0 %vm1699_vm8, %v1698_v17  ;;  %1528 = vmatpush3.bf16.msra.mxu0 %v1637_v14 }
 0x2dd   :  { %1529 = vmatprep.subr.bf16.mxu0 %v1698_v17 }
 0x2e0   :  { %1530 = vmatpush3.bf16.msra.mxu0 %v1638_v15 }
 0x2e1   :  { %1531 = vmatprep.subr.bf16.mxu0 %v1698_v17 }
 0x2e4   :  { %1532 = vmatpush3.bf16.msra.mxu0 %v1639_v16 }
 0x2e5   :  { %1533 = vmatprep.subr.bf16.mxu0 %v1698_v17 }
 0x2e8   :  { %1534 = vmatpush3.bf16.msra.mxu0 %v1640_v18 }
 0x2e9   :  { %1535 = vmatprep.subr.bf16.mxu0 %v1698_v17 }
 0x2ec   :  { %1536 = vmatpush3.bf16.msra.mxu0 %v1641_v20 }
 0x2ed   :  { %1537 = vmatprep.subr.bf16.mxu0 %v1698_v17 }
 0x2f0   :  { %1538 = vmatpush3.bf16.msra.mxu0 %v1642_v21 }
 0x2f1   :  { %1539 = vmatprep.subr.bf16.mxu0 %v1698_v17 }
 0x2f4   :  { %1540 = vmatpush3.bf16.msra.mxu0 %v1643_v60 }
 0x2f5   :  { %1541 = vmatprep.subr.bf16.mxu0 %v1698_v17 }
 0x2f8   :  { %1542 = vmatpush3.bf16.msra.mxu0 %v1644_v61 }
 0x3ae   :  { %v1505_v24 = vpop.f32.mrb[4].mxu0 }
 0x3af   :  { %v903_v26 = vpop.f32.mrb[5].mxu0  ;;  %v928_v27 = vadd.f32 %v1505_v24, %v925_v23 }
 0x3b0   :  { %v1506_v28 = vpop.f32.mrb[6].mxu0  ;;  %v926_v29 = vadd.f32 %v925_v23, %v903_v26 }
 0x3b1   :  { %v929_v30 = vadd.f32 %v1506_v28, %v925_v23  ;;  %v906_v31 = vpop.f32.mrb[7].mxu0  ;;  %v932_v35 = vmax.f32 %v928_v27, 0.0 }
 0x3b2   :  { %v927_v32 = vadd.f32 %v925_v23, %v906_v31  ;;  %v930_v37 = vmax.f32 %v926_v29, 0.0 }
 0x3b3   :  { %v933_v33 = vmax.f32 %v929_v30, 0.0 }
 0x3b4   :  { %v931_v36 = vmax.f32 %v927_v32, 0.0 }
 0x3b5   :  { %v940_v38 = vsel %vm936_vm9, %v933_v33, -inf }
 0x3b6   :  { %v948_v39 = vmax.f32 %v932_v35, %v940_v38  ;;  %v938_v40 = vsel %vm936_vm9, %v931_v36, -inf }
 0x3b7   :  { %v941_v41 = vmax.f32 %v930_v37, %v938_v40 }
 0x3b8   :  { %v949_v42 = vrot.slane %v948_v39, 4 }
 0x3b9   :  { %v942_v43 = vrot.slane %v941_v41, 4 }
 0x3ba   :  { %v950_v44 = vmax.f32 %v948_v39, %v949_v42 }
 0x3bb   :  { %v943_v45 = vmax.f32 %v941_v41, %v942_v43 }
 0x3bc   :  { %v951_v46 = vrot.slane %v950_v44, 2 }
 0x3bd   :  { %v944_v47 = vrot.slane %v943_v45, 2 }
 0x3be   :  { %v952_v48 = vmax.f32 %v950_v44, %v951_v46 }
 0x3bf   :  { %v945_v49 = vmax.f32 %v943_v45, %v944_v47 }
 0x3c0   :  { %v953_v50 = vrot.slane %v952_v48, 1 }
 0x3c1   :  { %v946_v51 = vrot.slane %v945_v49, 1 }
 0x3c2   :  { %v954_v52 = vmax.f32 %v952_v48, %v953_v50 }
 0x3c3   :  { %v947_v53 = vmax.f32 %v945_v49, %v946_v51 }
 0x3c4   :  { %v956_v54 = vpack.c.bf16 %v954_v52, %v954_v52 }
 0x3c5   :  { %v955_v55 = vpack.c.bf16 %v947_v53, %v947_v53 }
 0x3c6   :  { %v980_v56 = vunpack.c.l.b16 %v956_v54 }
 0x3c7   :  { %v979_v57 = vunpack.c.l.b16 %v955_v55 }
 0x3c9   :  { %v982_v58 = vsel %vm981_vm10, %v980_v56, %v979_v57 }
 0x3ca   :  { %v983_v59 = vpack.c.b16 %v982_v58, %v982_v58 }
 0x3cc   :  { %1524 = vmatmul.mubr.bf16.vlgmr.msra.gmra.mrb[4].mxu1 %v983_v59 }
 0x49f   :  { %v1067_v0 = vpop.f32.mrb[4].mxu1 }
 0x4a0   :  { %v1068_v1 = vadd.f32 %v1067_v0, %v976_v63  ;;  %v1525_v2 = vpop.f32.mrb[5].mxu1 }
 0x4a1   :  { %v1070_v3 = vpop.f32.mrb[6].mxu1 }
 0x4a2   :  { %v1073_v4 = vmax.f32 %v1068_v1, 0.0  ;;  %v1526_v5 = vpop.f32.mrb[7].mxu1 }
 0x4a4   :  { %v1074_v6 = vpack.c.bf16 %v1073_v4, %v1073_v4 }
 0x4a6   :  { %1544 = vmatmul.mubr.bf16.vlgmr.msra.gmra.mrb[8].mxu0 %v1074_v6 }
 0x579   :  { %v1177_v17 = vpop.f32.mrb[8].mxu0 }
 0x57a   :  { %v1178_v9 = vadd.f32 %v1177_v17, %v1094_v8  ;;  %v1545_v10 = vpop.f32.mrb[9].mxu0 }
 0x57b   :  { %v1180_v11 = vpop.f32.mrb[10].mxu0 }
 0x57c   :  { %1183 = vst [vmem:[#allocation5] sm:$0x3] %v1178_v9  ;;  %v1546_v12 = vpop.f32.mrb[11].mxu0 }
 0x57d   :  { %1678 = shalt.err (!%p1675_p12)
}
 0x57e   :  { %s1679_s11 = scalar_lea.hbm %s1831_s3, 32 }
 0x57f   :  { %p1680_p13 = scmp.ne.s32.totalorder %s1831_s3, %s1679_s11  ;;  %p1683_p0 = scmp.lt.u32.totalorder %s1679_s11, %s1831_s3 }
 0x581   :  { %p1685_p1 = pnand %p1683_p0, %p1680_p13 }
 0x583   :  { %1688 = shalt.err (!%p1685_p1)
}
 0x584   :  { %1193 = dma.vmem_to_hbm [thread:$0]  %s1191_s7, 32, %s1831_s3, [#allocation4]  }
 0x585   :  { %1691 = dma.done.wait [#allocation4], 32  }
 0x586   :  { %1692 = vsyncadd [#allocation4], 4294967264 }
 0x587   :  { %1197 = vsyncpa [#allocation3], 1 }
 0x588   :  { %1198 = vsyncpa [#allocation4], 1 }

</bundles_post_ra>
